<compile_context>
chip_gen: v5e
topology: v5e:2x2
jax: 0.10.0
libtpu: 0.0.40
codegen_flags: <defaults>
</compile_context>

<pallas_src>
import functools

import jax
import jax.numpy as jnp
from jax.experimental import pallas as pl
from jax.experimental.pallas import tpu as pltpu


# ----------------------------- hardware budgets ------------------------------


def _vmem_limit_bytes():
    """Generation-aware scoped-VMEM limit (leave ~25% headroom)."""
    try:
        cap = pltpu.get_tpu_info().vmem_capacity_bytes
    except Exception:  # info unavailable -> conservative (v7x-sized) default
        cap = 64 * 1024 * 1024
    return int(min(cap * 3 // 4, 100 * 1024 * 1024))


def _sublane_multiple(dtype):
    # Sub-32-bit dtypes pack along sublanes: f32 -> 8, bf16 -> 16, int8 -> 32.
    return max(8, 32 // jnp.dtype(dtype).itemsize)


def _channel_tile_candidates(c, sub_mult):
    """Divisors of C that are legal sublane tiles (multiple of sub_mult or == C)."""
    return [t for t in range(c, 0, -1)
            if c % t == 0 and (t % sub_mult == 0 or t == c)]


def _pick_tile_c(c, sub_mult):
    """Two-pass channel tile: prefer >= 2 tiles (v7x megacore on pass 1), <= 256."""
    cands = _channel_tile_candidates(c, sub_mult)
    pref = [t for t in cands if c // t >= 2 and t <= 256]
    if pref:
        return max(pref)
    small = [t for t in cands if t <= 256]
    return max(small) if small else c


def _pick_fused_tile_c(n, c, hw, elt_bytes, sub_mult, vmem_limit):
    """Largest channel tile whose (N, tile_c, HW) slab fits the fused budget
    (x + y double-buffered + f32 working copies); prefers >= 2 tiles. None if
    even the smallest legal tile does not fit (fall back to two-pass)."""
    def cost(t):
        blk = n * t * hw
        return blk * (4 * elt_bytes + 2 * 4)
    cands = [t for t in _channel_tile_candidates(c, sub_mult)
             if cost(t) <= vmem_limit]
    if not cands:
        return None
    multi = [t for t in cands if c // t >= 2]
    return max(multi) if multi else max(cands)


def _pick_tile_hw(hw, tile_c, elt_bytes, budget_bytes):
    """HW tile under the block budget.  Prefers 128-multiple divisors of HW;
    otherwise returns a 128-multiple non-divisor (cdiv grid + masked tail)
    instead of blowing past the budget with the full extent."""
    if tile_c * hw * elt_bytes <= budget_bytes:
        return hw
    max_lanes = (budget_bytes // (tile_c * elt_bytes)) // 128 * 128
    max_lanes = max(int(max_lanes), 128)
    t = max_lanes
    while t >= 128:
        if hw % t == 0:
            return t
        t -= 128
    return max_lanes  # no clean divisor: cdiv grid + masked tail


# -------------------- fused single-read kernel (fast path) -------------------


def _fused_bn_kernel(x_ref, gamma_ref, beta_ref, mm_ref, mv_ref,
                     y_ref, stats_ref, *, eps, momentum, count):
    # x block: (N, tile_c, HW), fully resident -> stats + normalize in one read.
    x = x_ref[...].astype(jnp.float32)
    inv_count = 1.0 / count
    mean = jnp.sum(jnp.sum(x, axis=2, keepdims=True),
                   axis=0, keepdims=True) * inv_count          # (1, tile_c, 1)
    xc = x - mean
    var = jnp.sum(jnp.sum(xc * xc, axis=2, keepdims=True),
                  axis=0, keepdims=True) * inv_count           # (1, tile_c, 1)
    inv_std = jax.lax.rsqrt(var + eps)
    gamma = gamma_ref[...].reshape(1, -1, 1)
    beta = beta_ref[...].reshape(1, -1, 1)
    y_ref[...] = (xc * (gamma * inv_std) + beta).astype(y_ref.dtype)

    # Moving-stat update packed as (tile_c, 2): [:, 0]=mean, [:, 1]=var.
    mean_c = mean.reshape(-1, 1)
    var_c = var.reshape(-1, 1)
    stats_ref[:, 0:1] = momentum * mm_ref[...] + (1.0 - momentum) * mean_c
    stats_ref[:, 1:2] = momentum * mv_ref[...] + (1.0 - momentum) * var_c


# ----------------------- two-pass kernels (large path) -----------------------


def _stats_kernel(x_ref, gamma_ref, beta_ref, mm_ref, mv_ref, stats_ref,
                  sum_ref, sumsq_ref, *, eps, momentum, count, hw, tile_hw,
                  needs_mask):
    # Grid = (c_tiles, N, hw_tiles); axes 1 and 2 are the reduction axes.
    n = pl.program_id(1)
    j = pl.program_id(2)
    n_last = pl.num_programs(1) - 1
    j_last = pl.num_programs(2) - 1

    @pl.when((n == 0) & (j == 0))
    def _init():
        sum_ref[...] = jnp.zeros_like(sum_ref)
        sumsq_ref[...] = jnp.zeros_like(sumsq_ref)

    x = x_ref[0].astype(jnp.float32)                      # (tile_c, tile_hw)
    if needs_mask:
        # cdiv grid with a non-dividing tile: zero padded lanes before summing.
        lane = jax.lax.broadcasted_iota(jnp.int32, x.shape, 1)
        x = jnp.where(lane < (hw - j * tile_hw), x, 0.0)

    # Both sums ride the same loaded vregs (single accumulation pass).
    sum_ref[...] += jnp.sum(x, axis=1, keepdims=True)
    sumsq_ref[...] += jnp.sum(x * x, axis=1, keepdims=True)

    @pl.when((n == n_last) & (j == j_last))
    def _finalize():
        inv_count = 1.0 / count
        mean = sum_ref[...] * inv_count                   # (tile_c, 1)
        # E[x^2] - mean^2 (clamped); the fused path uses the centered form.
        var = jnp.maximum(sumsq_ref[...] * inv_count - mean * mean, 0.0)
        inv_std = jax.lax.rsqrt(var + eps)
        scale = gamma_ref[...] * inv_std
        # Single packed (tile_c, 4) writeback: scale | shift | new_mm | new_mv.
        stats_ref[:, 0:1] = scale
        stats_ref[:, 1:2] = beta_ref[...] - mean * scale
        stats_ref[:, 2:3] = momentum * mm_ref[...] + (1.0 - momentum) * mean
        stats_ref[:, 3:4] = momentum * mv_ref[...] + (1.0 - momentum) * var


def _normalize_kernel(x_ref, stats_ref, y_ref):
    x = x_ref[0].astype(jnp.float32)                      # (tile_c, tile_hw)
    scale = stats_ref[:, 0:1]
    shift = stats_ref[:, 1:2]
    y_ref[0] = (x * scale + shift).astype(y_ref.dtype)


# --------------------------------- wrapper ----------------------------------


def my_batch_norm_4d(x_nchw, gamma, beta, moving_mean, moving_var,
                     eps=1e-5, momentum=0.1, allow_fused=True):
    """Training-mode forward of MYBatchNorm for 4D NCHW input.

    Returns (Y[N,C,H,W], moving_mean[1,C,1,1], moving_var[1,C,1,1]) matching
    the PyTorch `batch_norm` semantics for len(X.shape)==4, is_training=True
    (new_stat = momentum * moving + (1 - momentum) * batch_stat).
    """
    N, C, H, W = x_nchw.shape
    HW = H * W
    L = N * HW
    in_dtype = x_nchw.dtype
    elt_bytes = jnp.dtype(in_dtype).itemsize
    sub_mult = _sublane_multiple(in_dtype)
    vmem_limit = _vmem_limit_bytes()

    # Free, layout-preserving views (no HBM transpose anywhere).
    x = x_nchw.reshape(N, C, HW)
    g = gamma.reshape(C, 1).astype(jnp.float32)
    b = beta.reshape(C, 1).astype(jnp.float32)
    mm = moving_mean.reshape(C, 1).astype(jnp.float32)
    mv = moving_var.reshape(C, 1).astype(jnp.float32)

    # ------------------ fused single-read fast path ------------------
    fused_tile_c = (_pick_fused_tile_c(N, C, HW, elt_bytes, sub_mult, vmem_limit)
                    if allow_fused else None)
    if fused_tile_c is not None:
        tile_c = fused_tile_c
        n_c = C // tile_c
        slab_spec = pl.BlockSpec((N, tile_c, HW), lambda c: (0, c, 0))
        vec_spec = pl.BlockSpec((tile_c, 1), lambda c: (c, 0))
        kernel = functools.partial(_fused_bn_kernel, eps=float(eps),
                                   momentum=float(momentum), count=float(L))
        cost = pl.CostEstimate(
            flops=6 * N * C * HW, transcendentals=C,
            bytes_accessed=2 * N * C * HW * elt_bytes + 8 * C * 4)

        y, stats = pl.pallas_call(
            kernel,
            out_shape=(jax.ShapeDtypeStruct((N, C, HW), in_dtype),
                       jax.ShapeDtypeStruct((C, 2), jnp.float32)),
            grid_spec=pltpu.PrefetchScalarGridSpec(
                num_scalar_prefetch=0,
                grid=(n_c,),
                in_specs=[slab_spec, vec_spec, vec_spec, vec_spec, vec_spec],
                out_specs=[slab_spec,
                           pl.BlockSpec((tile_c, 2), lambda c: (c, 0))],
            ),
            compiler_params=pltpu.CompilerParams(
                dimension_semantics=("parallel",),
                vmem_limit_bytes=vmem_limit),
            cost_estimate=cost,
        )(x, g, b, mm, mv)

        new_mm = stats[:, 0]
        new_mv = stats[:, 1]
        return (y.reshape(N, C, H, W),
                new_mm.reshape(1, C, 1, 1), new_mv.reshape(1, C, 1, 1))

    # ------------------ two-pass path (large activations) ------------------
    tile_c = _pick_tile_c(C, sub_mult)
    n_c = C // tile_c
    vec_spec = pl.BlockSpec((tile_c, 1), lambda c, n, j: (c, 0))

    # ---- Pass 1: per-channel statistics (only x double-buffered) ----
    tile_hw1 = _pick_tile_hw(HW, tile_c, elt_bytes, vmem_limit // 3)
    n_hw1 = pl.cdiv(HW, tile_hw1)
    stats_kernel = functools.partial(
        _stats_kernel, eps=float(eps), momentum=float(momentum), count=float(L),
        hw=HW, tile_hw=tile_hw1, needs_mask=(HW % tile_hw1) != 0)
    stats_cost = pl.CostEstimate(
        flops=3 * N * C * HW, transcendentals=C,
        bytes_accessed=N * C * HW * elt_bytes + 8 * C * 4)

    stats = pl.pallas_call(
        stats_kernel,
        out_shape=jax.ShapeDtypeStruct((C, 4), jnp.float32),
        grid_spec=pltpu.PrefetchScalarGridSpec(
            num_scalar_prefetch=0,
            grid=(n_c, N, n_hw1),
            in_specs=[pl.BlockSpec((1, tile_c, tile_hw1),
                                   lambda c, n, j: (n, c, j)),
                      vec_spec, vec_spec, vec_spec, vec_spec],
            out_specs=pl.BlockSpec((tile_c, 4), lambda c, n, j: (c, 0)),
            scratch_shapes=[pltpu.VMEM((tile_c, 1), jnp.float32),
                            pltpu.VMEM((tile_c, 1), jnp.float32)],
        ),
        compiler_params=pltpu.CompilerParams(
            dimension_semantics=("parallel", "arbitrary", "arbitrary"),
            vmem_limit_bytes=vmem_limit),
        cost_estimate=stats_cost,
    )(x, g, b, mm, mv)

    # ---- Pass 2: y = scale * x + shift (x and y double-buffered) ----
    tile_hw2 = _pick_tile_hw(HW, tile_c, elt_bytes, vmem_limit // 5)
    n_hw2 = pl.cdiv(HW, tile_hw2)
    xy_spec = pl.BlockSpec((1, tile_c, tile_hw2), lambda c, n, j: (n, c, j))
    norm_cost = pl.CostEstimate(
        flops=2 * N * C * HW, transcendentals=0,
        bytes_accessed=2 * N * C * HW * elt_bytes + 4 * C * 4)

    y = pl.pallas_call(
        _normalize_kernel,
        out_shape=jax.ShapeDtypeStruct((N, C, HW), in_dtype),
        grid_spec=pltpu.PrefetchScalarGridSpec(
            num_scalar_prefetch=0,
            grid=(n_c, N, n_hw2),
            in_specs=[xy_spec,
                      pl.BlockSpec((tile_c, 4), lambda c, n, j: (c, 0))],
            out_specs=xy_spec,
        ),
        compiler_params=pltpu.CompilerParams(
            dimension_semantics=("parallel", "parallel", "parallel"),
            vmem_limit_bytes=vmem_limit),
        cost_estimate=norm_cost,
    )(x, stats)

    new_mm = stats[:, 2]
    new_mv = stats[:, 3]
    return (y.reshape(N, C, H, W),
            new_mm.reshape(1, C, 1, 1), new_mv.reshape(1, C, 1, 1))


# -------------------------------- reference ---------------------------------


def _reference(x, gamma, beta, mm, mv, eps=1e-5, momentum=0.1):
    mu = jnp.mean(x, axis=(0, 2, 3)).reshape(1, -1, 1, 1)
    var = jnp.mean((x - mu) ** 2, axis=(0, 2, 3)).reshape(1, -1, 1, 1)
    x_hat = (x - mu) / jnp.sqrt(var + eps)
    y = gamma.reshape(1, -1, 1, 1) * x_hat + beta.reshape(1, -1, 1, 1)
    new_mm = momentum * mm.reshape(1, -1, 1, 1) + (1.0 - momentum) * mu
    new_mv = momentum * mv.reshape(1, -1, 1, 1) + (1.0 - momentum) * var
    return y, new_mm, new_mv


if __name__ == "__main__":
    key = jax.random.PRNGKey(0)
    k_x, k_g = jax.random.split(key)

    N, C, H, W = 2, 4, 16, 16
    x = jax.random.normal(k_x, (N, C, H, W), dtype=jnp.float32)

    # Deterministic parameter init matching MYBatchNorm.reset_parameters():
    #   gamma ~ uniform(0, 1), beta = 0, moving_mean = 0, moving_var = 1
    gamma = jax.random.uniform(k_g, (C,), dtype=jnp.float32)
    beta = jnp.zeros((C,), dtype=jnp.float32)
    moving_mean = jnp.zeros((C,), dtype=jnp.float32)
    moving_var = jnp.ones((C,), dtype=jnp.float32)

    y_ref, mm_ref, mv_ref = _reference(x, gamma, beta, moving_mean, moving_var)

    # Fused single-read fast path (slab fits VMEM at this size).
    y, new_mm, new_mv = my_batch_norm_4d(x, gamma, beta, moving_mean, moving_var)
    jax.block_until_ready((y, new_mm, new_mv))
    assert jnp.allclose(y, y_ref, atol=1e-4, rtol=1e-4)
    assert jnp.allclose(new_mm, mm_ref, atol=1e-5, rtol=1e-5)
    assert jnp.allclose(new_mv, mv_ref, atol=1e-5, rtol=1e-5)

    # Two-pass path (used automatically when the per-channel slab exceeds the
    # VMEM budget); forced here so both code paths are validated.
    y2, mm2, mv2 = my_batch_norm_4d(x, gamma, beta, moving_mean, moving_var,
                                    allow_fused=False)
    jax.block_until_ready((y2, mm2, mv2))
    assert jnp.allclose(y2, y_ref, atol=1e-4, rtol=1e-4)
    assert jnp.allclose(mm2, mm_ref, atol=1e-5, rtol=1e-5)
    assert jnp.allclose(mv2, mv_ref, atol=1e-5, rtol=1e-5)

    print("KERNEL_OK")
</pallas_src>

<mosaic_0001>
module attributes {stable_mosaic.version = 11 : i64} {
  func.func @_fused_bn_kernel(%arg0: i32, %arg1: memref<2x4x256xf32, #tpu.memory_space<vmem>>, %arg2: memref<4x1xf32, #tpu.memory_space<vmem>>, %arg3: memref<4x1xf32, #tpu.memory_space<vmem>>, %arg4: memref<4x1xf32, #tpu.memory_space<vmem>>, %arg5: memref<4x1xf32, #tpu.memory_space<vmem>>, %arg6: memref<2x4x256xf32, #tpu.memory_space<vmem>>, %arg7: memref<4x2xf32, #tpu.memory_space<vmem>>) attributes {dimension_semantics = [#tpu.dimension_semantics<parallel>], iteration_bounds = array<i64: 1>, scalar_prefetch = 0 : i64, scratch_operands = 0 : i64, tpu.core_type = #tpu.core_type<tc>, window_params = [{transform_indices = @transform_0, window_bounds = array<i64: 2, 4, 256>}, {transform_indices = @transform_1, window_bounds = array<i64: 4, 1>}, {transform_indices = @transform_2, window_bounds = array<i64: 4, 1>}, {transform_indices = @transform_3, window_bounds = array<i64: 4, 1>}, {transform_indices = @transform_4, window_bounds = array<i64: 4, 1>}, {transform_indices = @transform_5, window_bounds = array<i64: 2, 4, 256>}, {transform_indices = @transform_6, window_bounds = array<i64: 4, 2>}]} {
    %c0 = arith.constant 0 : index
    %c0_0 = arith.constant 0 : index
    %c0_1 = arith.constant 0 : index
    %0 = vector.load %arg1[%c0, %c0_0, %c0_1] : memref<2x4x256xf32, #tpu.memory_space<vmem>>, vector<2x4x256xf32>
    %cst = arith.constant dense<0.000000e+00> : vector<2x4xf32>
    %1 = vector.multi_reduction <add>, %0, %cst [2] : vector<2x4x256xf32> to vector<2x4xf32>
    %2 = vector.shape_cast %1 : vector<2x4xf32> to vector<2x4x1xf32>
    %cst_2 = arith.constant dense<0.000000e+00> : vector<4x1xf32>
    %3 = vector.multi_reduction <add>, %2, %cst_2 [0] : vector<2x4x1xf32> to vector<4x1xf32>
    %4 = vector.shape_cast %3 : vector<4x1xf32> to vector<1x4x1xf32>
    %cst_3 = arith.constant 0.001953125 : f32
    %5 = vector.broadcast %cst_3 : f32 to vector<1x4x1xf32>
    %6 = arith.mulf %4, %5 : vector<1x4x1xf32>
    %7 = vector.broadcast %6 : vector<1x4x1xf32> to vector<2x4x256xf32>
    %8 = arith.subf %0, %7 : vector<2x4x256xf32>
    %9 = arith.mulf %8, %8 : vector<2x4x256xf32>
    %cst_4 = arith.constant dense<0.000000e+00> : vector<2x4xf32>
    %10 = vector.multi_reduction <add>, %9, %cst_4 [2] : vector<2x4x256xf32> to vector<2x4xf32>
    %11 = vector.shape_cast %10 : vector<2x4xf32> to vector<2x4x1xf32>
    %cst_5 = arith.constant dense<0.000000e+00> : vector<4x1xf32>
    %12 = vector.multi_reduction <add>, %11, %cst_5 [0] : vector<2x4x1xf32> to vector<4x1xf32>
    %13 = vector.shape_cast %12 : vector<4x1xf32> to vector<1x4x1xf32>
    %cst_6 = arith.constant 0.001953125 : f32
    %14 = vector.broadcast %cst_6 : f32 to vector<1x4x1xf32>
    %15 = arith.mulf %13, %14 : vector<1x4x1xf32>
    %cst_7 = arith.constant 9.99999974E-6 : f32
    %16 = vector.broadcast %cst_7 : f32 to vector<1x4x1xf32>
    %17 = arith.addf %15, %16 : vector<1x4x1xf32>
    %18 = math.rsqrt %17 : vector<1x4x1xf32>
    %c0_8 = arith.constant 0 : index
    %c0_9 = arith.constant 0 : index
    %19 = vector.load %arg2[%c0_8, %c0_9] : memref<4x1xf32, #tpu.memory_space<vmem>>, vector<4x1xf32>
    %20 = vector.shape_cast %19 : vector<4x1xf32> to vector<1x4x1xf32>
    %c0_10 = arith.constant 0 : index
    %c0_11 = arith.constant 0 : index
    %21 = vector.load %arg3[%c0_10, %c0_11] : memref<4x1xf32, #tpu.memory_space<vmem>>, vector<4x1xf32>
    %22 = vector.shape_cast %21 : vector<4x1xf32> to vector<1x4x1xf32>
    %23 = arith.mulf %20, %18 : vector<1x4x1xf32>
    %24 = vector.broadcast %23 : vector<1x4x1xf32> to vector<2x4x256xf32>
    %25 = arith.mulf %8, %24 : vector<2x4x256xf32>
    %26 = vector.broadcast %22 : vector<1x4x1xf32> to vector<2x4x256xf32>
    %27 = arith.addf %25, %26 : vector<2x4x256xf32>
    %c0_12 = arith.constant 0 : index
    %c0_13 = arith.constant 0 : index
    %c0_14 = arith.constant 0 : index
    %28 = vector.load %arg6[%c0_12, %c0_13, %c0_14] : memref<2x4x256xf32, #tpu.memory_space<vmem>>, vector<2x4x256xf32>
    tpu.vector_store %arg6[%c0_12, %c0_13, %c0_14], %27 {strides = array<i32>} : memref<2x4x256xf32, #tpu.memory_space<vmem>>, vector<2x4x256xf32>,
    %29 = vector.shape_cast %6 : vector<1x4x1xf32> to vector<4x1xf32>
    %30 = vector.shape_cast %15 : vector<1x4x1xf32> to vector<4x1xf32>
    %c0_15 = arith.constant 0 : index
    %c0_16 = arith.constant 0 : index
    %31 = vector.load %arg4[%c0_15, %c0_16] : memref<4x1xf32, #tpu.memory_space<vmem>>, vector<4x1xf32>
    %cst_17 = arith.constant 1.000000e-01 : f32
    %32 = vector.broadcast %cst_17 : f32 to vector<4x1xf32>
    %33 = arith.mulf %32, %31 : vector<4x1xf32>
    %cst_18 = arith.constant 0.899999976 : f32
    %34 = vector.broadcast %cst_18 : f32 to vector<4x1xf32>
    %35 = arith.mulf %34, %29 : vector<4x1xf32>
    %36 = arith.addf %33, %35 : vector<4x1xf32>
    %c0_19 = arith.constant 0 : index
    %c0_20 = arith.constant 0 : index
    %37 = vector.load %arg7[%c0_19, %c0_20] : memref<4x2xf32, #tpu.memory_space<vmem>>, vector<4x1xf32>
    tpu.vector_store %arg7[%c0_19, %c0_20], %36 {strides = array<i32>} : memref<4x2xf32, #tpu.memory_space<vmem>>, vector<4x1xf32>,
    %c0_21 = arith.constant 0 : index
    %c0_22 = arith.constant 0 : index
    %38 = vector.load %arg5[%c0_21, %c0_22] : memref<4x1xf32, #tpu.memory_space<vmem>>, vector<4x1xf32>
    %cst_23 = arith.constant 1.000000e-01 : f32
    %39 = vector.broadcast %cst_23 : f32 to vector<4x1xf32>
    %40 = arith.mulf %39, %38 : vector<4x1xf32>
    %cst_24 = arith.constant 0.899999976 : f32
    %41 = vector.broadcast %cst_24 : f32 to vector<4x1xf32>
    %42 = arith.mulf %41, %30 : vector<4x1xf32>
    %43 = arith.addf %40, %42 : vector<4x1xf32>
    %c0_25 = arith.constant 0 : index
    %c1 = arith.constant 1 : index
    %44 = vector.load %arg7[%c0_25, %c1] : memref<4x2xf32, #tpu.memory_space<vmem>>, vector<4x1xf32>
    tpu.vector_store %arg7[%c0_25, %c1], %43 {strides = array<i32>} : memref<4x2xf32, #tpu.memory_space<vmem>>, vector<4x1xf32>,
    return
  }
  func.func @transform_0(%arg0: i32) -> (i32, i32, i32) {
    %c0_i32 = arith.constant 0 : i32
    %c0_i32_0 = arith.constant 0 : i32
    %c0_i32_1 = arith.constant 0 : i32
    return %c0_i32, %arg0, %c0_i32_0 : i32, i32, i32
  }
  func.func @transform_1(%arg0: i32) -> (i32, i32) {
    %c0_i32 = arith.constant 0 : i32
    %c0_i32_0 = arith.constant 0 : i32
    return %arg0, %c0_i32 : i32, i32
  }
  func.func @transform_2(%arg0: i32) -> (i32, i32) {
    %c0_i32 = arith.constant 0 : i32
    %c0_i32_0 = arith.constant 0 : i32
    return %arg0, %c0_i32 : i32, i32
  }
  func.func @transform_3(%arg0: i32) -> (i32, i32) {
    %c0_i32 = arith.constant 0 : i32
    %c0_i32_0 = arith.constant 0 : i32
    return %arg0, %c0_i32 : i32, i32
  }
  func.func @transform_4(%arg0: i32) -> (i32, i32) {
    %c0_i32 = arith.constant 0 : i32
    %c0_i32_0 = arith.constant 0 : i32
    return %arg0, %c0_i32 : i32, i32
  }
  func.func @transform_5(%arg0: i32) -> (i32, i32, i32) {
    %c0_i32 = arith.constant 0 : i32
    %c0_i32_0 = arith.constant 0 : i32
    %c0_i32_1 = arith.constant 0 : i32
    return %c0_i32, %arg0, %c0_i32_0 : i32, i32, i32
  }
  func.func @transform_6(%arg0: i32) -> (i32, i32) {
    %c0_i32 = arith.constant 0 : i32
    %c0_i32_0 = arith.constant 0 : i32
    return %arg0, %c0_i32 : i32, i32
  }
}

</mosaic_0001>

<bundles_post_ra>
// kernel: tpu_custom_call.1
= control target key start
LH: loop header
LB: loop body
LE: loop exit
PB: predicated region body
PF: predicated region fallthrough
CT: control target
= control target key end

     0   :  { %s287_s0 = inlined_call_operand.vmem [shape: f32[2,4,256], index: 0, kind: input, shape index: {}]   ;;  %s288_s1 = inlined_call_operand.vmem [shape: f32[4,1], index: 1, kind: input, shape index: {}]   ;;  %s289_s2 = inlined_call_operand.vmem [shape: f32[4,1], index: 2, kind: input, shape index: {}]   ;;  %s290_s3 = inlined_call_operand.vmem [shape: f32[4,1], index: 3, kind: input, shape index: {}]   ;;  %s291_s4 = inlined_call_operand.vmem [shape: f32[4,1], index: 4, kind: input, shape index: {}]   ;;  %s292_s5 = inlined_call_operand.hbm [shape: f32[2,4,256], index: 5, kind: output, shape index: {0}]   ;;  %s293_s6 = inlined_call_operand.vmem [shape: f32[4,2], index: 6, kind: output, shape index: {1}]  }
   0x1   :  { %v23_v0 = vld [vmem:[%s287_s0] sm:$0xff]  ;;  %v24_v1 = vld [vmem:[%s287_s0 + $0x8] sm:$0xff] }
   0x2   :  { %12 = vsyncpa [#allocation3], 0  ;;  %27 = vst [vmem:[#allocation1] ss:$2 sm:$0xff] %v23_v0  ;;  %vm38_vm0 = vcmask 1043456   ;;  %vm132_vm1 = vcmask 3072  }
   0x3   :  { %31 = vst [vmem:[#allocation1 + $0x10] ss:$2 sm:$0xff] %v24_v1  ;;  %v202_v13 = vmov 839922192   ;;  %v128_v18 = vld [vmem:[%s290_s3] sm:$0xf] }
   0x4   :  { %v55_v14 = vunpack.c.l.s4 %v202_v13  ;;  %v129_v22 = vmul.f32 0.1, %v128_v18  ;;  %v203_v40 = vmov 0   ;;  %v134_v45 = vld [vmem:[%s291_s4] sm:$0xf]  ;;  %s204_s29 = smov 1  }
   0x5   :  { %172 = vset.pattern.permute.xlu2 %v203_v40  ;;  %173 = vset.pattern.permute.xlu0 %v203_v40  ;;  %v135_v48 = vmul.f32 0.1, %v134_v45  ;;  %v101_v58 = vld [vmem:[%s288_s1] sm:$0xf]  ;;  %vm142_vm5 = vcmask 11272   ;;  %s205_s1 = smov [#allocation2]  }
   0x6   :  { %v258_v19 = vunpack.c.0.s8 %v55_v14  ;;  %v102_v61 = vld [vmem:[%s289_s2] sm:$0xf]  ;;  %s148_s11 = sshll.u32 %s205_s1, 4  ;;  %s150_s14 = sshll.u32 %s292_s5, 4  ;;  %s149_s11 = int_to_ptr.vmem [resolvable:$true] %s148_s11  ;;  %s151_s14 = int_to_ptr.hbm [resolvable:$true] %s150_s14 }
   0x7   :  { %s206_s2 = smov 128   ;;  %s207_s15 = smov 8  }
   0x9   :  { %v28_v2 = vld.sshfl [vmem:[#allocation1] sm:$0xff pattern:$0x75316420]  ;;  %v29_v3 = vld.sshfl [vmem:[#allocation1 + $0x8] sm:$0xff pattern:$0x75316420] }
   0xa   :  { %v39_v4 = vsel %vm38_vm0, %v28_v2, 0.0  ;;  %v40_v5 = vsel %vm38_vm0, %v29_v3, 0.0  ;;  %v32_v7 = vld.sshfl [vmem:[#allocation1 + $0x10] sm:$0xff pattern:$0x75316420] }
   0xb   :  { %v41_v6 = vadd.f32 %v40_v5, %v39_v4  ;;  %v33_v8 = vld.sshfl [vmem:[#allocation1 + $0x18] sm:$0xff pattern:$0x75316420]  ;;  %v44_v9 = vsel %vm38_vm0, %v32_v7, 0.0 }
   0xc   :  { %v45_v10 = vsel %vm38_vm0, %v33_v8, 0.0 }
   0xd   :  { %42 = vadd.xlane.f32.xlu0 %v41_v6  ;;  %v46_v11 = vadd.f32 %v45_v10, %v44_v9 }
  0x15   :  { %47 = vadd.xlane.f32.xlu0 %v46_v11 }
  0x80   :  { %v43_v12 = vpop.xlane.xlu0 %42 }
  0x81   :  { %v49_v16 = vsel %vm38_vm0, %v43_v12, 0.0 }
  0x88   :  { %v48_v15 = vpop.xlane.xlu0 %47 }
  0x89   :  { %v50_v17 = vsel %vm38_vm0, %v48_v15, 0.0 }
  0x8a   :  { %v51_v20 = vadd.f32 %v50_v17, %v49_v16 }
  0x8c   :  { %v52_v21 = vmul.f32 0.001953125, %v51_v20 }
  0x8e   :  { %v57_v23 = vperm.slane %v52_v21, %v258_v19  ;;  %v130_v24 = vmul.f32 0.9, %v52_v21 }
  0x90   :  { %v59_v25 = vsub.f32 %v23_v0, %v57_v23  ;;  %v60_v26 = vsub.f32 %v24_v1, %v57_v23  ;;  %v131_v27 = vadd.f32 %v130_v24, %v129_v22 }
  0x92   :  { %v61_v28 = vmul.f32 %v59_v25, %v59_v25  ;;  %v62_v29 = vmul.f32 %v60_v26, %v60_v26  ;;  %133 = vst.msk [vmem:[%s293_s6] sm:$0xf] %vm132_vm1, %v131_v27 }
  0x94   :  { %65 = vst [vmem:[#allocation1] ss:$2 sm:$0xff] %v61_v28 }
  0x95   :  { %69 = vst [vmem:[#allocation1 + $0x10] ss:$2 sm:$0xff] %v62_v29 }
  0x9b   :  { %v66_v30 = vld.sshfl [vmem:[#allocation1] sm:$0xff pattern:$0x75316420]  ;;  %v67_v31 = vld.sshfl [vmem:[#allocation1 + $0x8] sm:$0xff pattern:$0x75316420] }
  0x9c   :  { %v76_v32 = vsel %vm38_vm0, %v66_v30, 0.0  ;;  %v77_v33 = vsel %vm38_vm0, %v67_v31, 0.0  ;;  %v70_v35 = vld.sshfl [vmem:[#allocation1 + $0x10] sm:$0xff pattern:$0x75316420] }
  0x9d   :  { %v78_v34 = vadd.f32 %v77_v33, %v76_v32  ;;  %v71_v36 = vld.sshfl [vmem:[#allocation1 + $0x18] sm:$0xff pattern:$0x75316420]  ;;  %v81_v37 = vsel %vm38_vm0, %v70_v35, 0.0 }
  0x9e   :  { %v82_v38 = vsel %vm38_vm0, %v71_v36, 0.0 }
  0x9f   :  { %79 = vadd.xlane.f32.xlu1 %v78_v34  ;;  %v83_v39 = vadd.f32 %v82_v38, %v81_v37 }
  0xa7   :  { %84 = vadd.xlane.f32.xlu1 %v83_v39 }
 0x112   :  { %v80_v41 = vpop.xlane.xlu1 %79 }
 0x113   :  { %v86_v43 = vsel %vm38_vm0, %v80_v41, 0.0 }
 0x11a   :  { %v85_v42 = vpop.xlane.xlu1 %84 }
 0x11b   :  { %v87_v44 = vsel %vm38_vm0, %v85_v42, 0.0 }
 0x11c   :  { %v88_v46 = vadd.f32 %v87_v44, %v86_v43 }
 0x11e   :  { %v89_v47 = vmul.f32 0.001953125, %v88_v46 }
 0x120   :  { %v90_v49 = vadd.f32 1e-05, %v89_v47  ;;  %v136_v50 = vmul.f32 0.9, %v89_v47 }
 0x122   :  { %174 = vrsqrt.f32 %v90_v49  ;;  %v137_v51 = vadd.f32 %v136_v50, %v135_v48  ;;  %vm97_vm3 = vweird.f32 %v90_v49 }
 0x124   :  { %139 = vrot.lane.b32.xlu0 %v137_v51, %s204_s29 }
 0x128   :  { %v175_v52 = vpop.eup %174 }
 0x129   :  { %v92_v53 = vmul.f32 %v175_v52, %v90_v49  ;;  %vm98_vm2 = vweird.f32 %v175_v52 }
 0x12a   :  { %vm99_vm4 = vmor %vm97_vm3, %vm98_vm2 }
 0x12b   :  { %v93_v54 = vmul.f32 %v175_v52, %v92_v53 }
 0x12d   :  { %v94_v55 = vmul.f32 0.5, %v93_v54 }
 0x12f   :  { %v95_v56 = vsub.f32 1.5, %v94_v55 }
 0x131   :  { %v96_v57 = vmul.f32 %v175_v52, %v95_v56 }
 0x133   :  { %v100_v59 = vsel %vm99_vm4, %v175_v52, %v96_v57 }
 0x134   :  { %v103_v60 = vmul.f32 %v101_v58, %v100_v59 }
 0x136   :  { %106 = vperm.xlu2 %172, %v103_v60  }
 0x13e   :  { %117 = vperm.xlu2 %172, %v102_v61  }
 0x190   :  { %v107_v62 = vpop.permute.xlu2 %106 }
 0x191   :  { %v111_v63 = vperm.slane %v107_v62, %v258_v19 }
 0x193   :  { %v113_v2 = vmul.f32 %v111_v63, %v59_v25  ;;  %v114_v3 = vmul.f32 %v111_v63, %v60_v26 }
 0x196   :  { %v140_v0 = vpop.permute.xlu0 %139 }
 0x197   :  { %143 = vst.msk [vmem:[%s293_s6] sm:$0xf] %vm142_vm5, %v140_v0 }
 0x198   :  { %v118_v1 = vpop.permute.xlu2 %117 }
 0x199   :  { %v122_v4 = vperm.slane %v118_v1, %v258_v19 }
 0x19b   :  { %v124_v5 = vadd.f32 %v122_v4, %v113_v2  ;;  %v125_v6 = vadd.f32 %v122_v4, %v114_v3 }
 0x19d   :  { %126 = vst [vmem:[#allocation2] sm:$0xff] %v124_v5 }
 0x19e   :  { %127 = vst [vmem:[#allocation2 + $0x8] sm:$0xff] %v125_v6 }
 0x19f   :  { %156 = dma.vmem_to_hbm [thread:$0]  %s149_s11, 256, %s151_s14, [#allocation3], %s206_s2, %s206_s2, %s207_s15  }
 0x1a0   :  { %200 = dma.done.wait [#allocation3], 256  }
 0x1a1   :  { %201 = vsyncadd [#allocation3], 4294967040 }
 0x1a2   :  { %165 = vsyncpa [#allocation3], 1 }

</bundles_post_ra>
